<compile_context>
chip_gen: v7x
topology: tpu7x:2x2x1
jax: 0.10.0
libtpu: 0.0.40
codegen_flags: <defaults>
</compile_context>

<pallas_src>
import math

import jax
import jax.numpy as jnp
from jax.experimental import pallas as pl
from jax.experimental.pallas import tpu as pltpu


def _swish_kernel(x_ref, scale_ref, o_ref):
    x = x_ref[...].astype(jnp.float32)        # (bm, L)
    s = scale_ref[...].astype(jnp.float32)    # (1,  L) — broadcasts over rows
    z = s * x
    # sigmoid(z) == 0.5 * (tanh(z / 2) + 1): one EUP transcendental, no VPU
    # divide chain.  EUP slot is otherwise idle for this kernel.
    sig = 0.5 * (jnp.tanh(0.5 * z) + 1.0)
    o_ref[...] = (x * sig).astype(o_ref.dtype)


def _plan_layout(n_elems, num_features, target_lanes):
    """Pick a lane-dense last dim L (multiple of lcm(F,128)) and padded size Np.

    Returns (L, Np).  L always satisfies L % F == 0 so a (1, L) tiled copy of
    scale broadcasts correctly over every row of the (M, L) slab.
    """
    F = num_features
    base = (F * 128) // math.gcd(F, 128)          # lcm(F, 128)
    if base > 8 * target_lanes:
        # Degenerate huge / awkward feature dim: keep the feature axis last.
        return F, n_elems                          # n_elems % F == 0 by construction
    if n_elems % base == 0:
        # Exact lane-dense layout, no padding (no extra HBM copy).
        L = base
        while L * 2 <= max(target_lanes, base) and n_elems % (L * 2) == 0:
            L *= 2
        return L, n_elems
    # No lane-dense L divides n_elems: pad up to the next multiple of L.
    k = max(1, min(target_lanes // base, pl.cdiv(n_elems, base)))
    L = base * k
    return L, pl.cdiv(n_elems, L) * L


def swish(x, scale, *, target_block_bytes=2 * 1024 * 1024, target_lanes=4096):
    """x: (..., F) array, scale: (F,) parameter.  Returns x * sigmoid(scale * x)."""
    orig_shape = x.shape
    F = orig_shape[-1]
    assert scale.shape == (F,)
    N = x.size
    if N == 0:
        return x

    L, Np = _plan_layout(N, F, target_lanes)
    pad = Np - N
    if pad:
        flat = jnp.pad(x.reshape(-1), (0, pad))    # zero pad; swish(0) == 0, discarded
        x2 = flat.reshape(-1, L)
    else:
        x2 = x.reshape(-1, L)
    M = x2.shape[0]
    scale2 = jnp.tile(scale, L // F).reshape(1, L)

    # Row tile sized at ~target_block_bytes per block.  With double buffering
    # (2x input + 2x output) that is ~8 MiB of VMEM: safely under v5e's 16 MiB
    # scoped default and well under the v6e/v7x 32 MiB scoped defaults.
    itemsize = jnp.dtype(x.dtype).itemsize
    sublane_mult = max(1, 32 // itemsize)          # 8 for f32, 16 for bf16, 32 for 8-bit
    bm = max(target_block_bytes // (L * itemsize), sublane_mult)
    bm = (bm // sublane_mult) * sublane_mult
    if bm >= M:
        bm = M                                     # single block covers the whole array

    grid = (pl.cdiv(M, bm),)

    out = pl.pallas_call(
        _swish_kernel,
        out_shape=jax.ShapeDtypeStruct((M, L), x.dtype),
        grid_spec=pltpu.PrefetchScalarGridSpec(
            num_scalar_prefetch=0,
            grid=grid,
            in_specs=[
                pl.BlockSpec((bm, L), lambda i: (i, 0)),   # x row-tile
                pl.BlockSpec((1, L), lambda i: (0, 0)),    # tiled scale, resident
            ],
            out_specs=pl.BlockSpec((bm, L), lambda i: (i, 0)),
        ),
        compiler_params=pltpu.CompilerParams(
            # Mem-bound elementwise op: parallel row axis lets v7x's 2 TCs both
            # stream HBM; neutral on v5e/v6e (single TC → sequential anyway).
            dimension_semantics=("parallel",),
        ),
    )(x2, scale2)

    if pad:
        return out.reshape(-1)[:N].reshape(orig_shape)
    return out.reshape(orig_shape)


if __name__ == "__main__":
    num_features = 32
    key = jax.random.PRNGKey(0)
    # Demo shape implied by the module: (batch=2, spatial=16, features=32).
    x = jax.random.normal(key, (2, 16, num_features), dtype=jnp.float32)
    # deterministic parameter init matching nn.Parameter(torch.ones(num_features))
    scale = jnp.ones((num_features,), dtype=jnp.float32)

    y = swish(x, scale)
    jax.block_until_ready(y)

    y_ref = x * jax.nn.sigmoid(scale * x)
    assert y.shape == x.shape and y.dtype == x.dtype
    assert jnp.allclose(y, y_ref, atol=1e-5, rtol=1e-5)

    # Second check: a shape whose element count is NOT divisible by lcm(F,128)
    # (exercises the zero-padded lane-dense path) plus a non-trivial scale.
    x3 = jax.random.normal(jax.random.PRNGKey(1), (3, 5, num_features), dtype=jnp.float32)
    scale3 = jax.random.normal(jax.random.PRNGKey(2), (num_features,), dtype=jnp.float32)
    y3 = swish(x3, scale3)
    jax.block_until_ready(y3)
    y3_ref = x3 * jax.nn.sigmoid(scale3 * x3)
    assert y3.shape == x3.shape and y3.dtype == x3.dtype
    assert jnp.allclose(y3, y3_ref, atol=1e-5, rtol=1e-5)

    print("KERNEL_OK")
</pallas_src>

<mosaic_0001>
module attributes {stable_mosaic.version = 11 : i64} {
  func.func @_swish_kernel(%arg0: i32, %arg1: memref<1x1024xf32, #tpu.memory_space<vmem>>, %arg2: memref<1x1024xf32, #tpu.memory_space<vmem>>, %arg3: memref<1x1024xf32, #tpu.memory_space<vmem>>) attributes {dimension_semantics = [#tpu.dimension_semantics<parallel>], iteration_bounds = array<i64: 1>, scalar_prefetch = 0 : i64, scratch_operands = 0 : i64, tpu.core_type = #tpu.core_type<tc>, window_params = [{transform_indices = @transform_0, window_bounds = array<i64: 1, 1024>}, {pipeline_mode = #tpu.pipeline_mode<synchronous>, transform_indices = @transform_1, window_bounds = array<i64: 1, 1024>}, {transform_indices = @transform_2, window_bounds = array<i64: 1, 1024>}]} {
    %c0 = arith.constant 0 : index
    %c0_0 = arith.constant 0 : index
    %0 = vector.load %arg1[%c0, %c0_0] : memref<1x1024xf32, #tpu.memory_space<vmem>>, vector<1x1024xf32>
    %c0_1 = arith.constant 0 : index
    %c0_2 = arith.constant 0 : index
    %1 = vector.load %arg2[%c0_1, %c0_2] : memref<1x1024xf32, #tpu.memory_space<vmem>>, vector<1x1024xf32>
    %2 = arith.mulf %1, %0 : vector<1x1024xf32>
    %cst = arith.constant 5.000000e-01 : f32
    %3 = vector.broadcast %cst : f32 to vector<1x1024xf32>
    %4 = arith.mulf %3, %2 : vector<1x1024xf32>
    %5 = math.tanh %4 : vector<1x1024xf32>
    %cst_3 = arith.constant 1.000000e+00 : f32
    %6 = vector.broadcast %cst_3 : f32 to vector<1x1024xf32>
    %7 = arith.addf %5, %6 : vector<1x1024xf32>
    %cst_4 = arith.constant 5.000000e-01 : f32
    %8 = vector.broadcast %cst_4 : f32 to vector<1x1024xf32>
    %9 = arith.mulf %8, %7 : vector<1x1024xf32>
    %10 = arith.mulf %0, %9 : vector<1x1024xf32>
    %c0_5 = arith.constant 0 : index
    %c0_6 = arith.constant 0 : index
    %11 = vector.load %arg3[%c0_5, %c0_6] : memref<1x1024xf32, #tpu.memory_space<vmem>>, vector<1x1024xf32>
    tpu.vector_store %arg3[%c0_5, %c0_6], %10 {strides = array<i32>} : memref<1x1024xf32, #tpu.memory_space<vmem>>, vector<1x1024xf32>,
    return
  }
  func.func @transform_0(%arg0: i32) -> (i32, i32) {
    %c0_i32 = arith.constant 0 : i32
    %c0_i32_0 = arith.constant 0 : i32
    return %arg0, %c0_i32 : i32, i32
  }
  func.func @transform_1(%arg0: i32) -> (i32, i32) {
    %c0_i32 = arith.constant 0 : i32
    %c0_i32_0 = arith.constant 0 : i32
    %c0_i32_1 = arith.constant 0 : i32
    return %c0_i32, %c0_i32_0 : i32, i32
  }
  func.func @transform_2(%arg0: i32) -> (i32, i32) {
    %c0_i32 = arith.constant 0 : i32
    %c0_i32_0 = arith.constant 0 : i32
    return %arg0, %c0_i32 : i32, i32
  }
}

</mosaic_0001>

<bundles_post_ra>
// kernel: tpu_custom_call.1
= control target key start
LH: loop header
LB: loop body
LE: loop exit
PB: predicated region body
PF: predicated region fallthrough
CT: control target
= control target key end

     0   :  { %7 = vsyncpa [#allocation3], 0  ;;  %s192_s0 = inlined_call_operand.hbm [shape: f32[1,1024], index: 0, kind: input, shape index: {}]   ;;  %s193_s1 = inlined_call_operand.hbm [shape: f32[1,1024], index: 1, kind: input, shape index: {}]   ;;  %s194_s2 = inlined_call_operand.hbm [shape: f32[1,1024], index: 2, kind: output, shape index: {}]  }
   0x1   :  { %8 = vsyncpa [#allocation6], 0 }
   0x2   :  { %9 = vsyncpa [#allocation4], 0  ;;  %s138_s9 = smov [#allocation2]   ;;  %s139_s11 = smov [#allocation5]  }
   0x3   :  { %s16_s10 = sshll.u32 %s138_s9, 4  ;;  %s26_s12 = sshll.u32 %s139_s11, 4  ;;  %s17_s10 = int_to_ptr.vmem [resolvable:$true] %s16_s10  ;;  %s27_s12 = int_to_ptr.vmem [resolvable:$true] %s26_s12 }
   0x4   :  { %s66_s15 = scalar_lea.hbm %s192_s0, 128 }
   0x5   :  { %p67_p0 = scmp.ne.s32.totalorder %s192_s0, %s66_s15  ;;  %p70_p1 = scmp.lt.u32.totalorder %s66_s15, %s192_s0 }
   0x7   :  { %p72_p2 = pnand %p70_p1, %p67_p0 }
   0x9   :  { %75 = shalt.err (!%p72_p2)
}
   0xa   :  { %s76_s20 = scalar_lea.vmem %s17_s10, 128  ;;  %p81_p4 = scmp.lt.s32.totalorder %s17_s10, %s17_s10 }
   0xb   :  { %p77_p3 = scmp.ne.s32.totalorder %s17_s10, %s76_s20  ;;  %p82_p5 = scmp.lt.s32.totalorder %s76_s20, %s76_s20 }
   0xd   :  { %p83_p6 = por %p82_p5, %p81_p4 }
   0xf   :  { %p84_p7 = pnand %p83_p6, %p77_p3 }
  0x11   :  { %87 = shalt.err (!%p84_p7)
}
  0x12   :  { %19 = dma.hbm_to_vmem [thread:$0]  %s192_s0, 128, %s17_s10, [#allocation3]  }
  0x13   :  { %s88_s25 = scalar_lea.hbm %s193_s1, 128 }
  0x14   :  { %p89_p8 = scmp.ne.s32.totalorder %s193_s1, %s88_s25  ;;  %p92_p9 = scmp.lt.u32.totalorder %s88_s25, %s193_s1 }
  0x16   :  { %p94_p10 = pnand %p92_p9, %p89_p8 }
  0x18   :  { %97 = shalt.err (!%p94_p10)
}
  0x19   :  { %s98_s30 = scalar_lea.vmem %s27_s12, 128  ;;  %p103_p12 = scmp.lt.s32.totalorder %s27_s12, %s27_s12 }
  0x1a   :  { %p99_p11 = scmp.ne.s32.totalorder %s27_s12, %s98_s30  ;;  %p104_p13 = scmp.lt.s32.totalorder %s98_s30, %s98_s30 }
  0x1c   :  { %p105_p0 = por %p104_p13, %p103_p12 }
  0x1e   :  { %p106_p1 = pnand %p105_p0, %p99_p11 }
  0x20   :  { %109 = shalt.err (!%p106_p1)
}
  0x21   :  { %29 = dma.hbm_to_vmem [thread:$0]  %s193_s1, 128, %s27_s12, [#allocation6]  }
  0x22   :  { %132 = dma.done.wait [#allocation3], 128  }
  0x23   :  { %133 = vsyncadd [#allocation3], 4294967168 }
  0x24   :  { %134 = dma.done.wait [#allocation6], 128  }
  0x25   :  { %135 = vsyncadd [#allocation6], 4294967168  ;;  %v36_v0 = vld [vmem:[#allocation2] sm:$0xff]  ;;  %v37_v1 = vld [vmem:[#allocation5] sm:$0xff]  ;;  %s140_s4 = smov [#allocation7]  }
  0x26   :  { %v38_v2 = vmul.f32 %v37_v1, %v36_v0  ;;  %s51_s5 = sshll.u32 %s140_s4, 4  ;;  %s52_s5 = int_to_ptr.vmem [resolvable:$true] %s51_s5 }
  0x27   :  { %s110_s6 = scalar_lea.vmem %s52_s5, 128  ;;  %p115_p3 = scmp.lt.s32.totalorder %s52_s5, %s52_s5 }
  0x28   :  { %v39_v3 = vmul.f32 0.5, %v38_v2  ;;  %p111_p2 = scmp.ne.s32.totalorder %s52_s5, %s110_s6  ;;  %p116_p4 = scmp.lt.s32.totalorder %s110_s6, %s110_s6 }
  0x2a   :  { %64 = vtanh.f32 %v39_v3  ;;  %p117_p5 = por %p116_p4, %p115_p3 }
  0x2c   :  { %p118_p6 = pnand %p117_p5, %p111_p2 }
  0x34   :  { %v65_v4 = vpop.eup %64 }
  0x35   :  { %v41_v5 = vadd.f32 1.0, %v65_v4 }
  0x37   :  { %v42_v6 = vmul.f32 0.5, %v41_v5 }
  0x39   :  { %v43_v7 = vmul.f32 %v42_v6, %v36_v0 }
  0x3b   :  { %44 = vst [vmem:[#allocation7] sm:$0xff] %v43_v7 }
  0x3c   :  { %121 = shalt.err (!%p118_p6)
}
  0x3d   :  { %s122_s8 = scalar_lea.hbm %s194_s2, 128 }
  0x3e   :  { %p123_p7 = scmp.ne.s32.totalorder %s194_s2, %s122_s8  ;;  %p126_p8 = scmp.lt.u32.totalorder %s122_s8, %s194_s2 }
  0x40   :  { %p128_p9 = pnand %p126_p8, %p123_p7 }
  0x42   :  { %131 = shalt.err (!%p128_p9)
}
  0x43   :  { %54 = dma.vmem_to_hbm [thread:$0]  %s52_s5, 128, %s194_s2, [#allocation4]  }
  0x44   :  { %136 = dma.done.wait [#allocation4], 128  }
  0x45   :  { %137 = vsyncadd [#allocation4], 4294967168 }
  0x46   :  { %58 = vsyncpa [#allocation3], 1 }
  0x47   :  { %59 = vsyncpa [#allocation6], 1 }
  0x48   :  { %60 = vsyncpa [#allocation4], 1 }

</bundles_post_ra>
